<compile_context>
chip_gen: v7x
topology: tpu7x:2x2x1
jax: 0.10.0
libtpu: 0.0.40
codegen_flags: <defaults>
</compile_context>

<pallas_src>
import jax
import jax.numpy as jnp
from jax.experimental import pallas as pl
from jax.experimental.pallas import tpu as pltpu


def _soft_ce_kernel(x_ref, t_ref, per_ref):
    """One (TN, C) tile: per-sample soft cross entropy, written to (TN, 1)."""
    x = x_ref[...].astype(jnp.float32)     # (TN, C) logits
    t = t_ref[...].astype(jnp.float32)     # (TN, C) soft labels

    # Numerically stable -log_softmax along the class (lane) axis.
    m = jnp.max(x, axis=1, keepdims=True)                        # (TN, 1)
    z = x - m                                                    # (TN, C)
    lse = jnp.log(jnp.sum(jnp.exp(z), axis=1, keepdims=True))    # (TN, 1)

    # sum_j t_j * (lse - z_j) = lse * sum_j t_j - sum_j t_j * z_j
    sum_t = jnp.sum(t, axis=1, keepdims=True)                    # (TN, 1)
    sum_tz = jnp.sum(t * z, axis=1, keepdims=True)               # (TN, 1)
    per_ref[...] = lse * sum_t - sum_tz


def _round_up(x, m):
    return (x + m - 1) // m * m


def soft_cross_entropy(inputs, targets, reduce=True,
                       target_tile_bytes=4 * 1024 * 1024):
    """Pallas implementation of softCrossEntropy.forward.

    inputs:  (N, C) logits        (f32 or bf16; kept in native dtype in HBM)
    targets: (N, C) soft labels
    returns: scalar if reduce else (N,) vector (float32)
    """
    assert inputs.ndim == 2 and inputs.shape == targets.shape
    N, C = inputs.shape

    # --- pick a batch tile: ~target_tile_bytes per input buffer, 8-row aligned.
    itemsize = max(jnp.dtype(inputs.dtype).itemsize,
                   jnp.dtype(targets.dtype).itemsize)
    row_bytes = C * itemsize
    tn = max(8, (target_tile_bytes // row_bytes) // 8 * 8)
    tn = min(tn, _round_up(N, 8))

    # --- pad the batch to a multiple of the tile (zero targets -> zero loss,
    #     zero logits -> finite log-softmax).
    n_pad = _round_up(N, tn)
    if n_pad != N:
        pad = n_pad - N
        inputs = jnp.pad(inputs, ((0, pad), (0, 0)))
        targets = jnp.pad(targets, ((0, pad), (0, 0)))
    num_tiles = n_pad // tn

    per_sample = pl.pallas_call(
        _soft_ce_kernel,
        out_shape=jax.ShapeDtypeStruct((n_pad, 1), jnp.float32),
        grid=(num_tiles,),
        in_specs=[
            pl.BlockSpec((tn, C), lambda i: (i, 0)),
            pl.BlockSpec((tn, C), lambda i: (i, 0)),
        ],
        out_specs=pl.BlockSpec((tn, 1), lambda i: (i, 0)),
        compiler_params=pltpu.CompilerParams(
            dimension_semantics=("parallel",),
            vmem_limit_bytes=48 * 1024 * 1024,
        ),
    )(inputs, targets)

    per_sample = per_sample[:N, 0]
    if reduce:
        # Divide by the TRUE sample count (not the padded/tile size).
        return jnp.sum(per_sample) / jnp.float32(N)
    return per_sample


if __name__ == "__main__":
    key = jax.random.PRNGKey(0)
    k1, k2 = jax.random.split(key)

    # --- small case matching the module's usage: (sample_num, class_num)
    N, C = 8, 32
    inputs = jax.random.normal(k1, (N, C), dtype=jnp.float32)
    targets = jax.nn.softmax(
        jax.random.normal(k2, (N, C), dtype=jnp.float32), axis=1)

    loss = soft_cross_entropy(inputs, targets, reduce=True)
    loss_vec = soft_cross_entropy(inputs, targets, reduce=False)
    jax.block_until_ready((loss, loss_vec))

    ref_nll = -jax.nn.log_softmax(inputs, axis=1)
    ref_reduced = jnp.sum(ref_nll * targets) / N
    ref_vec = jnp.sum(ref_nll * targets, axis=1)
    assert jnp.allclose(loss, ref_reduced, atol=1e-5, rtol=1e-5)
    assert jnp.allclose(loss_vec, ref_vec, atol=1e-5, rtol=1e-5)

    # --- exercise the tiled / padded / bf16 path (multiple grid steps,
    #     N not a multiple of the tile) by forcing a tiny tile budget.
    N2, C2 = 20, 48
    x2 = jax.random.normal(k1, (N2, C2), dtype=jnp.bfloat16)
    t2 = jax.nn.softmax(
        jax.random.normal(k2, (N2, C2), dtype=jnp.float32), axis=1
    ).astype(jnp.bfloat16)

    loss2_vec = soft_cross_entropy(x2, t2, reduce=False,
                                   target_tile_bytes=1024)
    jax.block_until_ready(loss2_vec)

    x2f = x2.astype(jnp.float32)
    t2f = t2.astype(jnp.float32)
    ref2_nll = -jax.nn.log_softmax(x2f, axis=1)
    ref2_vec = jnp.sum(ref2_nll * t2f, axis=1)
    assert jnp.allclose(loss2_vec, ref2_vec, atol=1e-4, rtol=1e-4)

    print("KERNEL_OK")
</pallas_src>

<mosaic_0001>
module attributes {stable_mosaic.version = 11 : i64} {
  func.func @_soft_ce_kernel(%arg0: i32, %arg1: memref<8x32xf32, #tpu.memory_space<vmem>>, %arg2: memref<8x32xf32, #tpu.memory_space<vmem>>, %arg3: memref<8x1xf32, #tpu.memory_space<vmem>>) attributes {dimension_semantics = [#tpu.dimension_semantics<parallel>], iteration_bounds = array<i64: 1>, scalar_prefetch = 0 : i64, scratch_operands = 0 : i64, tpu.core_type = #tpu.core_type<tc>, window_params = [{transform_indices = @transform_0, window_bounds = array<i64: 8, 32>}, {transform_indices = @transform_1, window_bounds = array<i64: 8, 32>}, {transform_indices = @transform_2, window_bounds = array<i64: 8, 1>}]} {
    %c0 = arith.constant 0 : index
    %c0_0 = arith.constant 0 : index
    %0 = vector.load %arg1[%c0, %c0_0] : memref<8x32xf32, #tpu.memory_space<vmem>>, vector<8x32xf32>
    %c0_1 = arith.constant 0 : index
    %c0_2 = arith.constant 0 : index
    %1 = vector.load %arg2[%c0_1, %c0_2] : memref<8x32xf32, #tpu.memory_space<vmem>>, vector<8x32xf32>
    %cst = arith.constant dense<0xFF800000> : vector<8xf32>
    %2 = vector.multi_reduction <maximumf>, %0, %cst [1] : vector<8x32xf32> to vector<8xf32>
    %3 = vector.shape_cast %2 : vector<8xf32> to vector<8x1xf32>
    %4 = vector.broadcast %3 : vector<8x1xf32> to vector<8x32xf32>
    %5 = arith.subf %0, %4 : vector<8x32xf32>
    %6 = math.exp %5 : vector<8x32xf32>
    %cst_3 = arith.constant dense<0.000000e+00> : vector<8xf32>
    %7 = vector.multi_reduction <add>, %6, %cst_3 [1] : vector<8x32xf32> to vector<8xf32>
    %8 = vector.shape_cast %7 : vector<8xf32> to vector<8x1xf32>
    %9 = math.log %8 : vector<8x1xf32>
    %cst_4 = arith.constant dense<0.000000e+00> : vector<8xf32>
    %10 = vector.multi_reduction <add>, %1, %cst_4 [1] : vector<8x32xf32> to vector<8xf32>
    %11 = vector.shape_cast %10 : vector<8xf32> to vector<8x1xf32>
    %12 = arith.mulf %1, %5 : vector<8x32xf32>
    %cst_5 = arith.constant dense<0.000000e+00> : vector<8xf32>
    %13 = vector.multi_reduction <add>, %12, %cst_5 [1] : vector<8x32xf32> to vector<8xf32>
    %14 = vector.shape_cast %13 : vector<8xf32> to vector<8x1xf32>
    %15 = arith.mulf %9, %11 : vector<8x1xf32>
    %16 = arith.subf %15, %14 : vector<8x1xf32>
    %c0_6 = arith.constant 0 : index
    %c0_7 = arith.constant 0 : index
    %17 = vector.load %arg3[%c0_6, %c0_7] : memref<8x1xf32, #tpu.memory_space<vmem>>, vector<8x1xf32>
    tpu.vector_store %arg3[%c0_6, %c0_7], %16 {strides = array<i32>} : memref<8x1xf32, #tpu.memory_space<vmem>>, vector<8x1xf32>,
    return
  }
  func.func @transform_0(%arg0: i32) -> (i32, i32) {
    %c0_i32 = arith.constant 0 : i32
    %c0_i32_0 = arith.constant 0 : i32
    return %arg0, %c0_i32 : i32, i32
  }
  func.func @transform_1(%arg0: i32) -> (i32, i32) {
    %c0_i32 = arith.constant 0 : i32
    %c0_i32_0 = arith.constant 0 : i32
    return %arg0, %c0_i32 : i32, i32
  }
  func.func @transform_2(%arg0: i32) -> (i32, i32) {
    %c0_i32 = arith.constant 0 : i32
    %c0_i32_0 = arith.constant 0 : i32
    return %arg0, %c0_i32 : i32, i32
  }
}

</mosaic_0001>

<bundles_post_ra>
// kernel: tpu_custom_call.1
= control target key start
LH: loop header
LB: loop body
LE: loop exit
PB: predicated region body
PF: predicated region fallthrough
CT: control target
= control target key end

     0   :  { %7 = vsyncpa [#allocation3], 0  ;;  %s164_s0 = inlined_call_operand.hbm [shape: f32[8,32], index: 0, kind: input, shape index: {}]   ;;  %s165_s1 = inlined_call_operand.hbm [shape: f32[8,32], index: 1, kind: input, shape index: {}]   ;;  %s166_s2 = inlined_call_operand.vmem [shape: f32[8,1], index: 2, kind: output, shape index: {}]  }
   0x1   :  { %8 = vsyncpa [#allocation5], 0  ;;  %s120_s9 = smov [#allocation2]   ;;  %s121_s11 = smov [#allocation4]  }
   0x2   :  { %s15_s10 = sshll.u32 %s120_s9, 4  ;;  %s25_s12 = sshll.u32 %s121_s11, 4  ;;  %s16_s10 = int_to_ptr.vmem [resolvable:$true] %s15_s10  ;;  %s26_s12 = int_to_ptr.vmem [resolvable:$true] %s25_s12 }
   0x3   :  { %s72_s15 = scalar_lea.hbm %s164_s0, 128 }
   0x4   :  { %p73_p0 = scmp.ne.s32.totalorder %s164_s0, %s72_s15  ;;  %p76_p1 = scmp.lt.u32.totalorder %s72_s15, %s164_s0 }
   0x6   :  { %p78_p2 = pnand %p76_p1, %p73_p0 }
   0x8   :  { %81 = shalt.err (!%p78_p2)
}
   0x9   :  { %s82_s20 = scalar_lea.vmem %s16_s10, 128  ;;  %p87_p4 = scmp.lt.s32.totalorder %s16_s10, %s16_s10 }
   0xa   :  { %p83_p3 = scmp.ne.s32.totalorder %s16_s10, %s82_s20  ;;  %p88_p5 = scmp.lt.s32.totalorder %s82_s20, %s82_s20 }
   0xc   :  { %p89_p6 = por %p88_p5, %p87_p4 }
   0xe   :  { %p90_p7 = pnand %p89_p6, %p83_p3 }
  0x10   :  { %93 = shalt.err (!%p90_p7)
}
  0x11   :  { %18 = dma.hbm_to_vmem [thread:$0]  %s164_s0, 128, %s16_s10, [#allocation3]  }
  0x12   :  { %s94_s25 = scalar_lea.hbm %s165_s1, 128 }
  0x13   :  { %p95_p8 = scmp.ne.s32.totalorder %s165_s1, %s94_s25  ;;  %p98_p9 = scmp.lt.u32.totalorder %s94_s25, %s165_s1 }
  0x15   :  { %p100_p10 = pnand %p98_p9, %p95_p8 }
  0x17   :  { %103 = shalt.err (!%p100_p10)
}
  0x18   :  { %s104_s30 = scalar_lea.vmem %s26_s12, 128  ;;  %p109_p12 = scmp.lt.s32.totalorder %s26_s12, %s26_s12 }
  0x19   :  { %p105_p11 = scmp.ne.s32.totalorder %s26_s12, %s104_s30  ;;  %p110_p13 = scmp.lt.s32.totalorder %s104_s30, %s104_s30 }
  0x1b   :  { %p111_p0 = por %p110_p13, %p109_p12 }
  0x1d   :  { %p112_p1 = pnand %p111_p0, %p105_p11 }
  0x1f   :  { %115 = shalt.err (!%p112_p1)
}
  0x20   :  { %28 = dma.hbm_to_vmem [thread:$0]  %s165_s1, 128, %s26_s12, [#allocation5]  }
  0x21   :  { %116 = dma.done.wait [#allocation3], 128  }
  0x22   :  { %117 = vsyncadd [#allocation3], 4294967168 }
  0x23   :  { %118 = dma.done.wait [#allocation5], 128  }
  0x24   :  { %119 = vsyncadd [#allocation5], 4294967168  ;;  %vm37_vm0 = vcmask 261120   ;;  %v35_v0 = vld [vmem:[#allocation2] sm:$0xff]  ;;  %v36_v2 = vld [vmem:[#allocation4] sm:$0xff]  ;;  %vm58_vm1 = vcmask 7168  }
  0x25   :  { %v38_v1 = vsel %vm37_vm0, %v35_v0, -inf  ;;  %v49_v3 = vsel %vm37_vm0, %v36_v2, 0.0 }
  0x26   :  { %39 = vmax.xlane.f32.xlu0 %v38_v1  ;;  %50 = vadd.xlane.f32.xlu1 %v49_v3 }
  0xb3   :  { %v40_v4 = vpop.xlane.xlu0 %39  ;;  %v51_v12 = vpop.xlane.xlu1 %50 }
  0xb4   :  { %v41_v5 = vsub.f32 %v35_v0, %v40_v4 }
  0xb6   :  { %v42_v6 = vmul.f32 1.442695, %v41_v5  ;;  %v52_v7 = vmul.f32 %v41_v5, %v36_v2 }
  0xb8   :  { %68 = vpow2.f32 %v42_v6  ;;  %v53_v8 = vsel %vm37_vm0, %v52_v7, 0.0 }
  0xb9   :  { %54 = vadd.xlane.f32.xlu1 %v53_v8 }
  0xc2   :  { %v69_v9 = vpop.eup %68 }
  0xc3   :  { %v44_v10 = vsel %vm37_vm0, %v69_v9, 0.0 }
  0xc4   :  { %45 = vadd.xlane.f32.xlu0 %v44_v10 }
 0x146   :  { %v55_v16 = vpop.xlane.xlu1 %54 }
 0x151   :  { %v46_v11 = vpop.xlane.xlu0 %45 }
 0x152   :  { %70 = vlog2.f32 %v46_v11 }
 0x15c   :  { %v71_v13 = vpop.eup %70 }
 0x15d   :  { %v48_v14 = vmul.f32 0.6931472, %v71_v13 }
 0x15f   :  { %v56_v15 = vmul.f32 %v51_v12, %v48_v14 }
 0x161   :  { %v57_v17 = vsub.f32 %v56_v15, %v55_v16 }
 0x163   :  { %59 = vst.msk [vmem:[%s166_s2] sm:$0xff] %vm58_vm1, %v57_v17 }
 0x164   :  { %64 = vsyncpa [#allocation3], 1 }
 0x165   :  { %65 = vsyncpa [#allocation5], 1 }

</bundles_post_ra>
